<compile_context>
chip_gen: v7x
topology: tpu7x:2x2x1
jax: 0.10.0
libtpu: 0.0.40
codegen_flags: <defaults>
</compile_context>

<pallas_src>
import jax
import jax.numpy as jnp
from jax import lax
from jax.experimental import pallas as pl
from jax.experimental.pallas import tpu as pltpu


def _rnn_kernel(x_ref, wih_ref, whh_ref, b_ref, wl_ref, bl_ref, out_ref):
    """Full T-step tanh-RNN + linear head in one invocation.

    x_ref   : (T*B, D) time-major, batch-flattened input
    wih_ref : (D, H)   = W_ih^T
    whh_ref : (H, H)   = W_hh^T
    b_ref   : (1, H)   = b_ih + b_hh (folded)
    wl_ref  : (H, O)   = W_lin^T
    bl_ref  : (1, O)
    out_ref : (B, O)
    """
    TB = x_ref.shape[0]
    B = out_ref.shape[0]
    H = whh_ref.shape[0]
    T = TB // B  # static

    # Hoisted input projection for ALL timesteps: one MXU call, folded bias.
    xp = (
        jnp.dot(x_ref[...], wih_ref[...], preferred_element_type=jnp.float32)
        + b_ref[...]
    )  # (T*B, H), stays live in vregs (tiny at these shapes)

    whh = whh_ref[...]  # read once, kept resident for the whole recurrence

    # Serial recurrence: only h_{t-1} @ W_hh^T is on the critical path.
    # Static unroll; x_t slices are sublane-aligned (B % 8 == 0) static slices.
    h = jnp.zeros((B, H), jnp.float32)
    for t in range(T):
        x_t = xp[t * B:(t + 1) * B, :]  # (B, H), static vreg-aligned slice
        h = jnp.tanh(
            x_t + jnp.dot(h, whh, preferred_element_type=jnp.float32)
        )

    out_ref[...] = (
        jnp.dot(h, wl_ref[...], preferred_element_type=jnp.float32)
        + bl_ref[...]
    ).astype(out_ref.dtype)


@jax.jit
def mnist_rnn_forward(x, w_ih, w_hh, b_ih, b_hh, w_lin, b_lin):
    """x: (B, T, D) float32 (batch_first, like the PyTorch module)."""
    B, T, D = x.shape
    H = w_ih.shape[0]
    O = w_lin.shape[0]

    # Time-major, batch-flattened input so the kernel does one (T*B, D) matmul
    # and each timestep is a contiguous, sublane-aligned row block.
    x_flat = jnp.transpose(x, (1, 0, 2)).reshape(T * B, D)
    wih_t = w_ih.T                        # (D, H)
    whh_t = w_hh.T                        # (H, H)
    wl_t = w_lin.T                        # (H, O)
    b_fold = (b_ih + b_hh).reshape(1, H)  # folded RNN bias
    bl2 = b_lin.reshape(1, O)

    vmem_spec = pl.BlockSpec(memory_space=pltpu.MemorySpace.VMEM)

    # TODO(synk): at real MNIST scale (large B / H), add a batch-tile
    # "parallel" grid axis so both v7x TensorCores run the batch-independent
    # recurrence; unnecessary (pure overhead) at these toy shapes.
    return pl.pallas_call(
        _rnn_kernel,
        out_shape=jax.ShapeDtypeStruct((B, O), jnp.float32),
        in_specs=[vmem_spec] * 6,
        out_specs=vmem_spec,
    )(x_flat, wih_t, whh_t, b_fold, wl_t, bl2)


def _reference_forward(x, w_ih, w_hh, b_ih, b_hh, w_lin, b_lin):
    """Pure-JAX reference mirroring torch.nn.RNN(batch_first=True) + Linear."""
    B = x.shape[0]
    H = w_ih.shape[0]
    h = jnp.zeros((B, H), jnp.float32)

    def step(h, x_t):
        h = jnp.tanh(x_t @ w_ih.T + b_ih + h @ w_hh.T + b_hh)
        return h, None

    h_last, _ = jax.lax.scan(step, h, jnp.transpose(x, (1, 0, 2)))
    return h_last @ w_lin.T + b_lin


if __name__ == "__main__":
    # Small shapes consistent with the module's forward:
    # batch=8, seq=8, input_size=16, hidden_size=32, output_size=16
    B, T, D, H, O = 8, 8, 16, 32, 16

    key = jax.random.PRNGKey(0)
    kx, k1, k2, k3, k4, k5, k6 = jax.random.split(key, 7)

    bound_rnn = 1.0 / jnp.sqrt(H)
    bound_lin = 1.0 / jnp.sqrt(H)

    x = jax.random.normal(kx, (B, T, D), jnp.float32)
    w_ih = jax.random.uniform(k1, (H, D), jnp.float32, -bound_rnn, bound_rnn)
    w_hh = jax.random.uniform(k2, (H, H), jnp.float32, -bound_rnn, bound_rnn)
    b_ih = jax.random.uniform(k3, (H,), jnp.float32, -bound_rnn, bound_rnn)
    b_hh = jax.random.uniform(k4, (H,), jnp.float32, -bound_rnn, bound_rnn)
    w_lin = jax.random.uniform(k5, (O, H), jnp.float32, -bound_lin, bound_lin)
    b_lin = jax.random.uniform(k6, (O,), jnp.float32, -bound_lin, bound_lin)

    out = mnist_rnn_forward(x, w_ih, w_hh, b_ih, b_hh, w_lin, b_lin)
    out = jax.block_until_ready(out)

    ref = _reference_forward(x, w_ih, w_hh, b_ih, b_hh, w_lin, b_lin)
    assert out.shape == (B, O)
    assert jnp.allclose(out, ref, atol=1e-5, rtol=1e-5), "mismatch vs reference"

    print("KERNEL_OK")
</pallas_src>

<mosaic_0001>
module attributes {stable_mosaic.version = 11 : i64} {
  func.func @_rnn_kernel(%arg0: memref<64x16xf32, #tpu.memory_space<vmem>>, %arg1: memref<16x32xf32, #tpu.memory_space<vmem>>, %arg2: memref<32x32xf32, #tpu.memory_space<vmem>>, %arg3: memref<1x32xf32, #tpu.memory_space<vmem>>, %arg4: memref<32x16xf32, #tpu.memory_space<vmem>>, %arg5: memref<1x16xf32, #tpu.memory_space<vmem>>, %arg6: memref<8x16xf32, #tpu.memory_space<vmem>>) attributes {dimension_semantics = [], scalar_prefetch = 0 : i64, scratch_operands = 0 : i64, tpu.core_type = #tpu.core_type<tc>} {
    %c0 = arith.constant 0 : index
    %c0_0 = arith.constant 0 : index
    %0 = vector.load %arg0[%c0, %c0_0] : memref<64x16xf32, #tpu.memory_space<vmem>>, vector<64x16xf32>
    %c0_1 = arith.constant 0 : index
    %c0_2 = arith.constant 0 : index
    %1 = vector.load %arg1[%c0_1, %c0_2] : memref<16x32xf32, #tpu.memory_space<vmem>>, vector<16x32xf32>
    %cst = arith.constant dense<0.000000e+00> : vector<64x32xf32>
    %2 = tpu.matmul %0, %1, %cst {dimension_numbers = #tpu.dot_dimension_numbers<[1], [0], [0], [1], [0, 0, 1, 1], [], []>} : vector<64x16xf32>, vector<16x32xf32>, vector<64x32xf32> -> vector<64x32xf32>
    %c0_3 = arith.constant 0 : index
    %c0_4 = arith.constant 0 : index
    %3 = vector.load %arg3[%c0_3, %c0_4] : memref<1x32xf32, #tpu.memory_space<vmem>>, vector<1x32xf32>
    %4 = vector.broadcast %3 : vector<1x32xf32> to vector<64x32xf32>
    %5 = arith.addf %2, %4 : vector<64x32xf32>
    %c0_5 = arith.constant 0 : index
    %c0_6 = arith.constant 0 : index
    %6 = vector.load %arg2[%c0_5, %c0_6] : memref<32x32xf32, #tpu.memory_space<vmem>>, vector<32x32xf32>
    %cst_7 = arith.constant 0.000000e+00 : f32
    %7 = vector.broadcast %cst_7 : f32 to vector<8x32xf32>
    %8 = vector.extract_strided_slice %5 {offsets = [0, 0], sizes = [8, 32], strides = [1, 1]} : vector<64x32xf32> to vector<8x32xf32>
    %cst_8 = arith.constant dense<0.000000e+00> : vector<8x32xf32>
    %9 = tpu.matmul %7, %6, %cst_8 {dimension_numbers = #tpu.dot_dimension_numbers<[1], [0], [0], [1], [0, 0, 1, 1], [], []>} : vector<8x32xf32>, vector<32x32xf32>, vector<8x32xf32> -> vector<8x32xf32>
    %10 = arith.addf %8, %9 : vector<8x32xf32>
    %11 = math.tanh %10 : vector<8x32xf32>
    %12 = vector.extract_strided_slice %5 {offsets = [8, 0], sizes = [8, 32], strides = [1, 1]} : vector<64x32xf32> to vector<8x32xf32>
    %cst_9 = arith.constant dense<0.000000e+00> : vector<8x32xf32>
    %13 = tpu.matmul %11, %6, %cst_9 {dimension_numbers = #tpu.dot_dimension_numbers<[1], [0], [0], [1], [0, 0, 1, 1], [], []>} : vector<8x32xf32>, vector<32x32xf32>, vector<8x32xf32> -> vector<8x32xf32>
    %14 = arith.addf %12, %13 : vector<8x32xf32>
    %15 = math.tanh %14 : vector<8x32xf32>
    %16 = vector.extract_strided_slice %5 {offsets = [16, 0], sizes = [8, 32], strides = [1, 1]} : vector<64x32xf32> to vector<8x32xf32>
    %cst_10 = arith.constant dense<0.000000e+00> : vector<8x32xf32>
    %17 = tpu.matmul %15, %6, %cst_10 {dimension_numbers = #tpu.dot_dimension_numbers<[1], [0], [0], [1], [0, 0, 1, 1], [], []>} : vector<8x32xf32>, vector<32x32xf32>, vector<8x32xf32> -> vector<8x32xf32>
    %18 = arith.addf %16, %17 : vector<8x32xf32>
    %19 = math.tanh %18 : vector<8x32xf32>
    %20 = vector.extract_strided_slice %5 {offsets = [24, 0], sizes = [8, 32], strides = [1, 1]} : vector<64x32xf32> to vector<8x32xf32>
    %cst_11 = arith.constant dense<0.000000e+00> : vector<8x32xf32>
    %21 = tpu.matmul %19, %6, %cst_11 {dimension_numbers = #tpu.dot_dimension_numbers<[1], [0], [0], [1], [0, 0, 1, 1], [], []>} : vector<8x32xf32>, vector<32x32xf32>, vector<8x32xf32> -> vector<8x32xf32>
    %22 = arith.addf %20, %21 : vector<8x32xf32>
    %23 = math.tanh %22 : vector<8x32xf32>
    %24 = vector.extract_strided_slice %5 {offsets = [32, 0], sizes = [8, 32], strides = [1, 1]} : vector<64x32xf32> to vector<8x32xf32>
    %cst_12 = arith.constant dense<0.000000e+00> : vector<8x32xf32>
    %25 = tpu.matmul %23, %6, %cst_12 {dimension_numbers = #tpu.dot_dimension_numbers<[1], [0], [0], [1], [0, 0, 1, 1], [], []>} : vector<8x32xf32>, vector<32x32xf32>, vector<8x32xf32> -> vector<8x32xf32>
    %26 = arith.addf %24, %25 : vector<8x32xf32>
    %27 = math.tanh %26 : vector<8x32xf32>
    %28 = vector.extract_strided_slice %5 {offsets = [40, 0], sizes = [8, 32], strides = [1, 1]} : vector<64x32xf32> to vector<8x32xf32>
    %cst_13 = arith.constant dense<0.000000e+00> : vector<8x32xf32>
    %29 = tpu.matmul %27, %6, %cst_13 {dimension_numbers = #tpu.dot_dimension_numbers<[1], [0], [0], [1], [0, 0, 1, 1], [], []>} : vector<8x32xf32>, vector<32x32xf32>, vector<8x32xf32> -> vector<8x32xf32>
    %30 = arith.addf %28, %29 : vector<8x32xf32>
    %31 = math.tanh %30 : vector<8x32xf32>
    %32 = vector.extract_strided_slice %5 {offsets = [48, 0], sizes = [8, 32], strides = [1, 1]} : vector<64x32xf32> to vector<8x32xf32>
    %cst_14 = arith.constant dense<0.000000e+00> : vector<8x32xf32>
    %33 = tpu.matmul %31, %6, %cst_14 {dimension_numbers = #tpu.dot_dimension_numbers<[1], [0], [0], [1], [0, 0, 1, 1], [], []>} : vector<8x32xf32>, vector<32x32xf32>, vector<8x32xf32> -> vector<8x32xf32>
    %34 = arith.addf %32, %33 : vector<8x32xf32>
    %35 = math.tanh %34 : vector<8x32xf32>
    %36 = vector.extract_strided_slice %5 {offsets = [56, 0], sizes = [8, 32], strides = [1, 1]} : vector<64x32xf32> to vector<8x32xf32>
    %cst_15 = arith.constant dense<0.000000e+00> : vector<8x32xf32>
    %37 = tpu.matmul %35, %6, %cst_15 {dimension_numbers = #tpu.dot_dimension_numbers<[1], [0], [0], [1], [0, 0, 1, 1], [], []>} : vector<8x32xf32>, vector<32x32xf32>, vector<8x32xf32> -> vector<8x32xf32>
    %38 = arith.addf %36, %37 : vector<8x32xf32>
    %39 = math.tanh %38 : vector<8x32xf32>
    %c0_16 = arith.constant 0 : index
    %c0_17 = arith.constant 0 : index
    %40 = vector.load %arg4[%c0_16, %c0_17] : memref<32x16xf32, #tpu.memory_space<vmem>>, vector<32x16xf32>
    %cst_18 = arith.constant dense<0.000000e+00> : vector<8x16xf32>
    %41 = tpu.matmul %39, %40, %cst_18 {dimension_numbers = #tpu.dot_dimension_numbers<[1], [0], [0], [1], [0, 0, 1, 1], [], []>} : vector<8x32xf32>, vector<32x16xf32>, vector<8x16xf32> -> vector<8x16xf32>
    %c0_19 = arith.constant 0 : index
    %c0_20 = arith.constant 0 : index
    %42 = vector.load %arg5[%c0_19, %c0_20] : memref<1x16xf32, #tpu.memory_space<vmem>>, vector<1x16xf32>
    %43 = vector.broadcast %42 : vector<1x16xf32> to vector<8x16xf32>
    %44 = arith.addf %41, %43 : vector<8x16xf32>
    %c0_21 = arith.constant 0 : index
    %c0_22 = arith.constant 0 : index
    %45 = vector.load %arg6[%c0_21, %c0_22] : memref<8x16xf32, #tpu.memory_space<vmem>>, vector<8x16xf32>
    tpu.vector_store %arg6[%c0_21, %c0_22], %44 {strides = array<i32>} : memref<8x16xf32, #tpu.memory_space<vmem>>, vector<8x16xf32>,
    return
  }
}

</mosaic_0001>

<bundles_post_ra>
// kernel: mnist_rnn_forward.1
= control target key start
LH: loop header
LB: loop body
LE: loop exit
PB: predicated region body
PF: predicated region fallthrough
CT: control target
= control target key end

     0   :  { %vm41_vm0 = vcmask 130048   ;;  %v1165_v3 = vmov 0.0|0.0   ;;  %vm1166_vm1 = vmmov 0   ;;  %v1167_v10 = vmov 0.0   ;;  %s1360_s0 = inlined_call_operand.vmem [shape: f32[64,16], index: 0, kind: input, shape index: {}]   ;;  %s1361_s1 = inlined_call_operand.vmem [shape: f32[16,32], index: 1, kind: input, shape index: {}]   ;;  %s1362_s2 = inlined_call_operand.vmem [shape: f32[32,32], index: 2, kind: input, shape index: {}]   ;;  %s1363_s3 = inlined_call_operand.vmem [shape: f32[1,32], index: 3, kind: input, shape index: {}]   ;;  %s1364_s4 = inlined_call_operand.vmem [shape: f32[32,16], index: 4, kind: input, shape index: {}]   ;;  %s1365_s5 = inlined_call_operand.vmem [shape: f32[1,16], index: 5, kind: input, shape index: {}]   ;;  %s1366_s6 = inlined_call_operand.hbm [shape: f32[8,16], index: 6, kind: output, shape index: {}]  }
   0x1   :  { %v32_v0 = vld [vmem:[%s1361_s1] sm:$0xff]  ;;  %v33_v1 = vld [vmem:[%s1361_s1 + $0x8] sm:$0xff]  ;;  %1067 = vmatprep.subr.bf16.mxu1 %v1165_v3  ;;  %v173_v8 = vld [vmem:[%s1362_s2 + $0x10] sm:$0xff]  ;;  %972 = vmatprep.mubr.msk.f32.mxu1 %vm1166_vm1, %v1167_v10 }
   0x2   :  { %v171_v2 = vld [vmem:[%s1362_s2] sm:$0xff]  ;;  %v1063_v4 = vpack.c.bf16 %v33_v1, %v32_v0  ;;  %v172_v5 = vld [vmem:[%s1362_s2 + $0x8] sm:$0xff]  ;;  %v174_v9 = vld [vmem:[%s1362_s2 + $0x18] sm:$0xff] }
   0x3   :  { %v24_v6 = vld [vmem:[%s1360_s0] sm:$0xff]  ;;  %v1220_v7 = vpack.c.bf16 %v172_v5, %v171_v2 }
   0x4   :  { %952 = vmatprep.mubr.msk.f32.mxu0 %vm41_vm0, %v24_v6 }
   0x5   :  { %11 = vsyncpa [#allocation3], 0  ;;  %1064 = vmatprep.subr.bf16.mxu0 %v1063_v4  ;;  %1069 = vmatpush3.bf16.msra.mxu1 %v1220_v7  ;;  %v25_v11 = vld [vmem:[%s1360_s0 + $0x8] sm:$0xff]  ;;  %v1235_v12 = vpack.c.bf16 %v174_v9, %v173_v8  ;;  %v26_v13 = vld [vmem:[%s1360_s0 + $0x10] sm:$0xff]  ;;  %vm175_vm2 = vcmask 261120   ;;  %s1168_s8 = smov [#allocation2]  }
   0x6   :  { %1066 = vmatpush3.bf16.msra.mxu0 %v1063_v4  ;;  %1070 = vmatprep.subr.bf16.mxu1 %v1165_v3  ;;  %v1260_v14 = vld [vmem:[%s1363_s3] ss:$0 sm:$0xff]  ;;  %v27_v22 = vld [vmem:[%s1360_s0 + $0x18] sm:$0xff]  ;;  %v29_v24 = vld [vmem:[%s1360_s0 + $0x28] sm:$0xff] }
   0x7   :  { %1079 = vmatprep.subr.bf16.mxu0 %v1165_v3  ;;  %v28_v23 = vld [vmem:[%s1360_s0 + $0x20] sm:$0xff]  ;;  %v30_v25 = vld [vmem:[%s1360_s0 + $0x30] sm:$0xff]  ;;  %v31_v26 = vld [vmem:[%s1360_s0 + $0x38] sm:$0xff] }
   0x8   :  { %v776_v63 = vld [vmem:[%s1364_s4] sm:$0xff]  ;;  %v777_v0 = vld [vmem:[%s1364_s4 + $0x8] sm:$0xff]  ;;  %v778_v1 = vld [vmem:[%s1364_s4 + $0x10] sm:$0xff] }
   0x9   :  { %953 = vmatmul.mubr.msk.f32.vlgmr.msra.gmra.mrb[0].mxu0 %vm41_vm0, %v25_v11  ;;  %1072 = vmatpush3.bf16.msra.mxu1 %v1235_v12  ;;  %v1116_v2 = vpack.c.bf16 %v777_v0, %v776_v63  ;;  %v779_v4 = vld [vmem:[%s1364_s4 + $0x18] sm:$0xff]  ;;  %v891_v11 = vld [vmem:[%s1365_s5] ss:$0 sm:$0xff]  ;;  %s867_s4 = sshll.u32 %s1168_s8, 4  ;;  %s868_s4 = int_to_ptr.vmem [resolvable:$true] %s867_s4 }
   0xa   :  { %1081 = vmatpush3.bf16.msra.mxu0 %v1220_v7  ;;  %1073 = vmatprep.subr.bf16.mxu1 %v1165_v3  ;;  %v1119_v5 = vpack.c.bf16 %v779_v4, %v778_v1  ;;  %s1141_s9 = scalar_lea.vmem %s868_s4, 128  ;;  %p1146_p1 = scmp.lt.s32.totalorder %s868_s4, %s868_s4 }
   0xb   :  { %1082 = vmatprep.subr.bf16.mxu0 %v1165_v3  ;;  %955 = vmatprep.mubr.msk.f32.mxu0 %vm41_vm0, %v26_v13  ;;  %p1142_p0 = scmp.ne.s32.totalorder %s868_s4, %s1141_s9  ;;  %p1147_p2 = scmp.lt.s32.totalorder %s1141_s9, %s1141_s9 }
   0xc   :  { %973 = vmatmul.mubr.f32.vlgmr.msra.gmra.mrb[0].mxu1 %v1167_v10 }
   0xd   :  { %1075 = vmatpush3.bf16.msra.mxu1 %v1220_v7  ;;  %983 = vmatprep.mubr.msk.f32.mxu1 %vm1166_vm1, %v1167_v10  ;;  %p1148_p3 = por %p1147_p2, %p1146_p1 }
   0xe   :  { %1076 = vmatprep.subr.bf16.mxu1 %v1165_v3  ;;  %1084 = vmatpush3.bf16.msra.mxu0 %v1235_v12 }
   0xf   :  { %1091 = vmatprep.subr.bf16.mxu0 %v1165_v3  ;;  %956 = vmatmul.mubr.msk.f32.gmra.mrb[2].mxu0 %vm41_vm0, %v27_v22  ;;  %p1149_p4 = pnand %p1148_p3, %p1142_p0 }
  0x10   :  { %958 = vmatprep.mubr.msk.f32.mxu0 %vm41_vm0, %v28_v23 }
  0x11   :  { %1078 = vmatpush3.bf16.msra.mxu1 %v1235_v12 }
  0x12   :  { %1085 = vmatprep.subr.bf16.mxu1 %v1165_v3 }
  0x13   :  { %959 = vmatmul.mubr.msk.f32.gmra.mrb[4].mxu0 %vm41_vm0, %v29_v24 }
  0x14   :  { %961 = vmatprep.mubr.msk.f32.mxu0 %vm41_vm0, %v30_v25 }
  0x17   :  { %962 = vmatmul.mubr.msk.f32.gmra.mrb[6].mxu0 %vm41_vm0, %v31_v26 }
  0x18   :  { %994 = vmatprep.mubr.msk.f32.mxu0 %vm1166_vm1, %v1167_v10 }
  0xdc   :  { %v954_v15 = vpop.f32.mrb[0].mxu0 }
  0xdd   :  { %v132_v16 = vpop.f32.mrb[1].mxu0  ;;  %v138_v27 = vadd.f32 %v954_v15, %v1260_v14 }
  0xde   :  { %v133_v17 = vadd.f32 %v1260_v14, %v132_v16 }
  0xdf   :  { %v245_v18 = vpop.f32.mrb[0].mxu1 }
  0xe0   :  { %v249_v19 = vadd.f32 %v245_v18, %v133_v17  ;;  %v974_v20 = vpop.f32.mrb[1].mxu1 }
  0xe2   :  { %1125 = vtanh.f32 %v249_v19  ;;  %v957_v32 = vpop.f32.mrb[2].mxu0 }
  0xe3   :  { %v142_v33 = vpop.f32.mrb[3].mxu0  ;;  %v148_v43 = vadd.f32 %v957_v32, %v1260_v14 }
  0xe4   :  { %v143_v38 = vadd.f32 %v1260_v14, %v142_v33 }
  0xe6   :  { %v960_v34 = vpop.f32.mrb[4].mxu0 }
  0xe7   :  { %v152_v35 = vpop.f32.mrb[5].mxu0  ;;  %v158_v53 = vadd.f32 %v960_v34, %v1260_v14 }
  0xe8   :  { %v153_v48 = vadd.f32 %v1260_v14, %v152_v35 }
  0xea   :  { %v963_v36 = vpop.f32.mrb[6].mxu0 }
  0xeb   :  { %v162_v37 = vpop.f32.mrb[7].mxu0  ;;  %v168_v6 = vadd.f32 %v963_v36, %v1260_v14 }
  0xec   :  { %v1126_v21 = vpop.eup %1125  ;;  %v163_v58 = vadd.f32 %v1260_v14, %v162_v37 }
  0xed   :  { %984 = vmatmul.mubr.msk.f32.vlgmr.msra.gmra.mrb[2].mxu1 %vm175_vm2, %v1126_v21 }
  0xee   :  { %1087 = vmatpush3.bf16.msra.mxu1 %v1220_v7  ;;  %1005 = vmatprep.mubr.msk.f32.mxu1 %vm1166_vm1, %v1167_v10 }
  0xef   :  { %1088 = vmatprep.subr.bf16.mxu1 %v1165_v3 }
  0xf2   :  { %1090 = vmatpush3.bf16.msra.mxu1 %v1235_v12 }
  0xf3   :  { %1097 = vmatprep.subr.bf16.mxu1 %v1165_v3 }
 0x1c0   :  { %v320_v28 = vpop.f32.mrb[2].mxu1 }
 0x1c1   :  { %v324_v29 = vadd.f32 %v320_v28, %v138_v27  ;;  %v985_v30 = vpop.f32.mrb[3].mxu1 }
 0x1c3   :  { %1127 = vtanh.f32 %v324_v29 }
 0x1cd   :  { %v1128_v31 = vpop.eup %1127 }
 0x1ce   :  { %995 = vmatmul.mubr.msk.f32.vlgmr.msra.gmra.mrb[8].mxu0 %vm175_vm2, %v1128_v31 }
 0x1cf   :  { %1093 = vmatpush3.bf16.msra.mxu0 %v1220_v7  ;;  %1016 = vmatprep.mubr.msk.f32.mxu0 %vm1166_vm1, %v1167_v10 }
 0x1d0   :  { %1094 = vmatprep.subr.bf16.mxu0 %v1165_v3 }
 0x1d3   :  { %1096 = vmatpush3.bf16.msra.mxu0 %v1235_v12 }
 0x1d4   :  { %1103 = vmatprep.subr.bf16.mxu0 %v1165_v3 }
 0x2a1   :  { %v395_v39 = vpop.f32.mrb[8].mxu0 }
 0x2a2   :  { %v399_v40 = vadd.f32 %v395_v39, %v143_v38  ;;  %v996_v41 = vpop.f32.mrb[9].mxu0 }
 0x2a4   :  { %1129 = vtanh.f32 %v399_v40 }
 0x2ae   :  { %v1130_v42 = vpop.eup %1129 }
 0x2af   :  { %1006 = vmatmul.mubr.msk.f32.vlgmr.msra.gmra.mrb[4].mxu1 %vm175_vm2, %v1130_v42 }
 0x2b0   :  { %1099 = vmatpush3.bf16.msra.mxu1 %v1220_v7  ;;  %1027 = vmatprep.mubr.msk.f32.mxu1 %vm1166_vm1, %v1167_v10 }
 0x2b1   :  { %1100 = vmatprep.subr.bf16.mxu1 %v1165_v3 }
 0x2b4   :  { %1102 = vmatpush3.bf16.msra.mxu1 %v1235_v12 }
 0x2b5   :  { %1109 = vmatprep.subr.bf16.mxu1 %v1165_v3 }
 0x382   :  { %v470_v44 = vpop.f32.mrb[4].mxu1 }
 0x383   :  { %v474_v45 = vadd.f32 %v470_v44, %v148_v43  ;;  %v1007_v46 = vpop.f32.mrb[5].mxu1 }
 0x385   :  { %1131 = vtanh.f32 %v474_v45 }
 0x38f   :  { %v1132_v47 = vpop.eup %1131 }
 0x390   :  { %1017 = vmatmul.mubr.msk.f32.vlgmr.msra.gmra.mrb[10].mxu0 %vm175_vm2, %v1132_v47 }
 0x391   :  { %1105 = vmatpush3.bf16.msra.mxu0 %v1220_v7  ;;  %1038 = vmatprep.mubr.msk.f32.mxu0 %vm1166_vm1, %v1167_v10 }
 0x392   :  { %1106 = vmatprep.subr.bf16.mxu0 %v1165_v3 }
 0x395   :  { %1108 = vmatpush3.bf16.msra.mxu0 %v1235_v12 }
 0x396   :  { %1115 = vmatprep.subr.bf16.mxu0 %v1165_v3 }
 0x463   :  { %v545_v49 = vpop.f32.mrb[10].mxu0 }
 0x464   :  { %v549_v50 = vadd.f32 %v545_v49, %v153_v48  ;;  %v1018_v51 = vpop.f32.mrb[11].mxu0 }
 0x466   :  { %1133 = vtanh.f32 %v549_v50 }
 0x470   :  { %v1134_v52 = vpop.eup %1133 }
 0x471   :  { %1028 = vmatmul.mubr.msk.f32.vlgmr.msra.gmra.mrb[6].mxu1 %vm175_vm2, %v1134_v52 }
 0x472   :  { %1111 = vmatpush3.bf16.msra.mxu1 %v1220_v7  ;;  %1049 = vmatprep.mubr.msk.f32.mxu1 %vm1166_vm1, %v1167_v10 }
 0x473   :  { %1112 = vmatprep.subr.bf16.mxu1 %v1165_v3 }
 0x476   :  { %1114 = vmatpush3.bf16.msra.mxu1 %v1235_v12 }
 0x544   :  { %v620_v54 = vpop.f32.mrb[6].mxu1 }
 0x545   :  { %v624_v55 = vadd.f32 %v620_v54, %v158_v53  ;;  %v1029_v56 = vpop.f32.mrb[7].mxu1 }
 0x547   :  { %1135 = vtanh.f32 %v624_v55 }
 0x551   :  { %v1136_v57 = vpop.eup %1135 }
 0x552   :  { %1039 = vmatmul.mubr.msk.f32.vlgmr.msra.gmra.mrb[12].mxu0 %vm175_vm2, %v1136_v57 }
 0x553   :  { %1060 = vmatprep.mubr.msk.f32.mxu0 %vm1166_vm1, %v1167_v10  ;;  %1117 = vmatpush3.bf16.msra.mxu0 %v1116_v2 }
 0x554   :  { %1118 = vmatprep.subr.bf16.mxu0 %v1165_v3 }
 0x557   :  { %1120 = vmatpush3.bf16.msra.mxu0 %v1119_v5 }
 0x625   :  { %v695_v59 = vpop.f32.mrb[12].mxu0 }
 0x626   :  { %v699_v60 = vadd.f32 %v695_v59, %v163_v58  ;;  %v1040_v61 = vpop.f32.mrb[13].mxu0 }
 0x628   :  { %1137 = vtanh.f32 %v699_v60 }
 0x632   :  { %v1138_v62 = vpop.eup %1137 }
 0x633   :  { %1050 = vmatmul.mubr.msk.f32.vlgmr.msra.gmra.mrb[8].mxu1 %vm175_vm2, %v1138_v62 }
 0x706   :  { %v770_v7 = vpop.f32.mrb[8].mxu1 }
 0x707   :  { %v774_v8 = vadd.f32 %v770_v7, %v168_v6  ;;  %v1051_v9 = vpop.f32.mrb[9].mxu1 }
 0x709   :  { %1139 = vtanh.f32 %v774_v8 }
 0x713   :  { %v1140_v10 = vpop.eup %1139 }
 0x714   :  { %1061 = vmatmul.mubr.msk.f32.vlgmr.msra.gmra.mrb[14].mxu0 %vm175_vm2, %v1140_v10 }
 0x7e7   :  { %v856_v12 = vpop.f32.mrb[14].mxu0 }
 0x7e8   :  { %v857_v13 = vadd.f32 %v891_v11, %v856_v12  ;;  %v1062_v15 = vpop.f32.mrb[15].mxu0 }
 0x7ea   :  { %860 = vst.msk [vmem:[#allocation2] sm:$0xff] %vm41_vm0, %v857_v13 }
 0x7eb   :  { %1152 = shalt.err (!%p1149_p4)
}
 0x7ec   :  { %s1153_s2 = scalar_lea.hbm %s1366_s6, 128 }
 0x7ed   :  { %p1154_p5 = scmp.ne.s32.totalorder %s1366_s6, %s1153_s2  ;;  %p1157_p6 = scmp.lt.u32.totalorder %s1153_s2, %s1366_s6 }
 0x7ef   :  { %p1159_p7 = pnand %p1157_p6, %p1154_p5 }
 0x7f1   :  { %1162 = shalt.err (!%p1159_p7)
}
 0x7f2   :  { %870 = dma.vmem_to_hbm [thread:$0]  %s868_s4, 128, %s1366_s6, [#allocation3]  }
 0x7f3   :  { %1163 = dma.done.wait [#allocation3], 128  }
 0x7f4   :  { %1164 = vsyncadd [#allocation3], 4294967168 }
 0x7f5   :  { %874 = vsyncpa [#allocation3], 1 }

</bundles_post_ra>
